<compile_context>
chip_gen: v6e
topology: v6e:2x2x1
jax: 0.10.0
libtpu: 0.0.40
codegen_flags: <defaults>
</compile_context>

<pallas_src>
import functools

import jax
import jax.numpy as jnp
from jax.experimental import pallas as pl
from jax.experimental.pallas import tpu as pltpu


def _distill_kl_kernel(ys_ref, yt_ref, o_ref, acc_ref, *,
                       inv_t, batch, block_rows, blocks_per_partial):
    j = pl.program_id(1)

    @pl.when(j == 0)
    def _init():
        acc_ref[...] = jnp.zeros_like(acc_ref)

    # Global rows covered by this (unclamped) block. Rows >= batch are padding:
    # either the remainder of the last block or a fully duplicated (clamped)
    # block; they are dropped with a single row-level select below.
    row_block = pl.program_id(0) * blocks_per_partial + j
    row_ids = row_block * block_rows + jax.lax.broadcasted_iota(
        jnp.int32, (block_rows, 1), 0)
    valid = row_ids < batch

    ys = ys_ref[...].astype(jnp.float32) * inv_t
    yt = yt_ref[...].astype(jnp.float32) * inv_t

    # Student log-softmax pieces (row-local, lane-axis reductions).
    ys_sh = ys - jnp.max(ys, axis=-1, keepdims=True)
    log_z_s = jnp.log(jnp.sum(jnp.exp(ys_sh), axis=-1, keepdims=True))

    # Teacher softmax pieces.
    yt_sh = yt - jnp.max(yt, axis=-1, keepdims=True)
    exp_t = jnp.exp(yt_sh)
    z_t = jnp.sum(exp_t, axis=-1, keepdims=True)
    log_z_t = jnp.log(z_t)

    # Per row:  sum_c p_t * (log p_t - log p_s)
    #   = [sum_c exp_t * (yt_sh - ys_sh)] / z_t + (log_z_s - log_z_t)
    # -> one divide and one add per ROW; no per-element broadcast of the
    #    per-row constant, no materialized log-prob temporaries.
    s1 = jnp.sum(exp_t * (yt_sh - ys_sh), axis=-1, keepdims=True)
    row_kl = s1 / z_t + (log_z_s - log_z_t)

    # Select (not multiply): any NaN/Inf produced in padded rows stays in its
    # own row (all reductions above are row-local) and is dropped here.
    acc_ref[...] += jnp.where(valid, row_kl, 0.0)

    @pl.when(j == pl.num_programs(1) - 1)
    def _finalize():
        total = jnp.sum(acc_ref[...], keepdims=True)          # (1, 1)
        o_ref[...] = jnp.broadcast_to(total, o_ref.shape)     # lane-dense slab


def _tpu_vmem_capacity_bytes():
    try:
        return int(pltpu.get_tpu_info().vmem_capacity_bytes)
    except Exception:
        return 64 * 1024 * 1024            # conservative (v7x-sized) fallback


def _is_multicore_tensorcore_chip():
    # v7x has 2 TensorCores per chip; v5e / v6e have 1.
    try:
        kind = jax.devices()[0].device_kind.lower()
    except Exception:
        return False
    return "v7" in kind


def distill_kl(y_s, y_t, T, *, block_rows=512, num_partials=None):
    """JAX/Pallas equivalent of DistillKL(T)(y_s, y_t). Returns a scalar f32.

    block_rows: upper bound on rows per streamed tile (auto-shrunk so the
      double-buffered input footprint fits the chip's VMEM budget).
    num_partials: size of the leading grid axis; None -> 2 on multi-TC chips
      (v7x, CORE_PARALLEL) and 1 on single-TC chips (v5e / v6e).
    """
    assert y_s.shape == y_t.shape and y_s.ndim == 2
    B, C = y_s.shape

    itemsize = max(jnp.dtype(y_s.dtype).itemsize, jnp.dtype(y_t.dtype).itemsize)
    vmem_cap = _tpu_vmem_capacity_bytes()
    # Budget for the double-buffered input tiles: ~half of physical VMEM,
    # never more than 64 MiB (big tiles on v5e/v6e, still fits v7x's 64 MiB).
    budget = min(vmem_cap // 2, 64 * 1024 * 1024)
    per_row_bytes = 4 * C * itemsize        # 2 tensors x 2 pipeline buffers
    tb_cap = max(8, ((budget // per_row_bytes) // 8) * 8)

    if B <= block_rows and B <= tb_cap:
        tb = B                              # full-array block: no (8,128) rule
    else:
        tb = max(8, min((block_rows // 8) * 8, tb_cap))

    nblocks = pl.cdiv(B, tb)
    multi_core = _is_multicore_tensorcore_chip()
    if num_partials is None:
        num_partials = 2 if multi_core else 1
    nparts = max(1, min(int(num_partials), nblocks))
    bpp = pl.cdiv(nblocks, nparts)          # row blocks per partial

    # VMEM request: actual double-buffered footprint + headroom, clamped
    # below the chip's physical VMEM.
    footprint = 4 * tb * C * itemsize
    vmem_limit = int(min(max(footprint + (8 << 20), 32 << 20),
                         max(vmem_cap - (8 << 20), 16 << 20)))

    def in_map(c, j):
        # Clamp so the DMA never targets an out-of-range block; the kernel
        # masks the duplicated rows so they contribute exactly zero.
        return (jnp.minimum(c * bpp + j, nblocks - 1), 0)

    kernel = functools.partial(
        _distill_kl_kernel,
        inv_t=1.0 / float(T),
        batch=B,
        block_rows=tb,
        blocks_per_partial=bpp,
    )

    lead_sem = (pltpu.CORE_PARALLEL
                if (multi_core and nparts > 1) else pltpu.ARBITRARY)

    partial_slab = pl.pallas_call(
        kernel,
        out_shape=jax.ShapeDtypeStruct((nparts * 8, 128), jnp.float32),
        grid_spec=pltpu.PrefetchScalarGridSpec(
            num_scalar_prefetch=0,
            grid=(nparts, bpp),
            in_specs=[
                pl.BlockSpec((tb, C), in_map),
                pl.BlockSpec((tb, C), in_map),
            ],
            out_specs=pl.BlockSpec((8, 128), lambda c, j: (c, 0)),
            scratch_shapes=[pltpu.VMEM((tb, 1), jnp.float32)],
        ),
        compiler_params=pltpu.CompilerParams(
            dimension_semantics=(lead_sem, pltpu.ARBITRARY),
            vmem_limit_bytes=vmem_limit,
        ),
    )(y_s, y_t)

    partials = partial_slab[0::8, 0]        # one scalar per partial
    return jnp.sum(partials) * (float(T) * float(T) / B)


def _distill_kl_ref(y_s, y_t, T):
    """Pure-JAX reference for verification (f32 math)."""
    y_s = y_s.astype(jnp.float32)
    y_t = y_t.astype(jnp.float32)
    log_p_s = jax.nn.log_softmax(y_s / T, axis=1)
    p_t = jax.nn.softmax(y_t / T, axis=1)
    log_p_t = jax.nn.log_softmax(y_t / T, axis=1)
    return jnp.sum(p_t * (log_p_t - log_p_s)) * (T ** 2) / y_s.shape[0]


if __name__ == "__main__":
    key = jax.random.PRNGKey(0)
    k1, k2, k3, k4 = jax.random.split(key, 4)
    T = 4.0

    # 1) Small classification-style logits [batch, num_classes].
    B, C = 4, 10
    y_s = jax.random.normal(k1, (B, C), dtype=jnp.float32)
    y_t = jax.random.normal(k2, (B, C), dtype=jnp.float32)
    loss = jax.block_until_ready(distill_kl(y_s, y_t, T))
    ref = _distill_kl_ref(y_s, y_t, T)
    assert jnp.allclose(loss, ref, rtol=2e-4, atol=1e-6), (loss, ref)

    # 2) Tiled + masked path: B not a multiple of the row tile.
    B2, C2 = 21, 10
    y_s2 = jax.random.normal(k3, (B2, C2), dtype=jnp.float32)
    y_t2 = jax.random.normal(k4, (B2, C2), dtype=jnp.float32)
    ref2 = _distill_kl_ref(y_s2, y_t2, T)
    loss2 = jax.block_until_ready(distill_kl(y_s2, y_t2, T, block_rows=8))
    assert jnp.allclose(loss2, ref2, rtol=2e-4, atol=1e-6), (loss2, ref2)

    # Forced two-partial path: exercises the partial-combine plus the clamped
    # duplicate-block masking on any chip generation (CORE_PARALLEL is only
    # requested on multi-TC chips, "arbitrary" elsewhere).
    loss2b = jax.block_until_ready(
        distill_kl(y_s2, y_t2, T, block_rows=8, num_partials=2))
    assert jnp.allclose(loss2b, ref2, rtol=2e-4, atol=1e-6), (loss2b, ref2)

    # 3) bf16 logits streamed straight from HBM (math stays f32 in-kernel).
    y_s3 = y_s2.astype(jnp.bfloat16)
    y_t3 = y_t2.astype(jnp.bfloat16)
    loss3 = jax.block_until_ready(distill_kl(y_s3, y_t3, T))
    ref3 = _distill_kl_ref(y_s3, y_t3, T)
    assert jnp.allclose(loss3, ref3, rtol=2e-4, atol=1e-6), (loss3, ref3)

    print("KERNEL_OK")
</pallas_src>

<mosaic_0001>
module attributes {stable_mosaic.version = 11 : i64} {
  func.func @_distill_kl_kernel(%arg0: i32, %arg1: i32, %arg2: memref<4x10xf32, #tpu.memory_space<vmem>>, %arg3: memref<4x10xf32, #tpu.memory_space<vmem>>, %arg4: memref<8x128xf32, #tpu.memory_space<vmem>>, %arg5: memref<4x1xf32, #tpu.memory_space<vmem>>) attributes {dimension_semantics = [#tpu.dimension_semantics<arbitrary>, #tpu.dimension_semantics<arbitrary>], iteration_bounds = array<i64: 1, 1>, scalar_prefetch = 0 : i64, scratch_operands = 1 : i64, tpu.core_type = #tpu.core_type<tc>, window_params = [{transform_indices = @transform_0, window_bounds = array<i64: 4, 10>}, {transform_indices = @transform_1, window_bounds = array<i64: 4, 10>}, {transform_indices = @transform_2, window_bounds = array<i64: 8, 128>}]} {
    %c0_i32 = arith.constant 0 : i32
    %0 = arith.cmpi eq, %arg1, %c0_i32 : i32
    %1 = arith.extui %0 : i1 to i32
    %c0_i32_0 = arith.constant 0 : i32
    %2 = arith.cmpi ne, %1, %c0_i32_0 : i32
    scf.if %2 {
      %cst_18 = arith.constant 0.000000e+00 : f32
      %48 = vector.broadcast %cst_18 : f32 to vector<4x1xf32>
      %c0_19 = arith.constant 0 : index
      %c0_20 = arith.constant 0 : index
      %49 = vector.load %arg5[%c0_19, %c0_20] : memref<4x1xf32, #tpu.memory_space<vmem>>, vector<4x1xf32>
      tpu.vector_store %arg5[%c0_19, %c0_20], %48 {strides = array<i32>} : memref<4x1xf32, #tpu.memory_space<vmem>>, vector<4x1xf32>,
    } else {
    }
    %c1_i32 = arith.constant 1 : i32
    %3 = arith.muli %arg0, %c1_i32 : i32
    %4 = arith.addi %3, %arg1 : i32
    %c4_i32 = arith.constant 4 : i32
    %5 = arith.muli %4, %c4_i32 : i32
    %6 = tpu.iota {dimensions = array<i32: 0>} : vector<4x1xi32>
    %7 = vector.broadcast %5 : i32 to vector<4x1xi32>
    %8 = arith.addi %7, %6 : vector<4x1xi32>
    %c4_i32_1 = arith.constant 4 : i32
    %9 = vector.broadcast %c4_i32_1 : i32 to vector<4x1xi32>
    %10 = arith.cmpi slt, %8, %9 : vector<4x1xi32>
    %c0 = arith.constant 0 : index
    %c0_2 = arith.constant 0 : index
    %11 = vector.load %arg2[%c0, %c0_2] : memref<4x10xf32, #tpu.memory_space<vmem>>, vector<4x10xf32>
    %cst = arith.constant 2.500000e-01 : f32
    %12 = vector.broadcast %cst : f32 to vector<4x10xf32>
    %13 = arith.mulf %11, %12 : vector<4x10xf32>
    %c0_3 = arith.constant 0 : index
    %c0_4 = arith.constant 0 : index
    %14 = vector.load %arg3[%c0_3, %c0_4] : memref<4x10xf32, #tpu.memory_space<vmem>>, vector<4x10xf32>
    %cst_5 = arith.constant 2.500000e-01 : f32
    %15 = vector.broadcast %cst_5 : f32 to vector<4x10xf32>
    %16 = arith.mulf %14, %15 : vector<4x10xf32>
    %cst_6 = arith.constant dense<0xFF800000> : vector<4xf32>
    %17 = vector.multi_reduction <maximumf>, %13, %cst_6 [1] : vector<4x10xf32> to vector<4xf32>
    %18 = vector.shape_cast %17 : vector<4xf32> to vector<4x1xf32>
    %19 = vector.broadcast %18 : vector<4x1xf32> to vector<4x10xf32>
    %20 = arith.subf %13, %19 : vector<4x10xf32>
    %21 = math.exp %20 : vector<4x10xf32>
    %cst_7 = arith.constant dense<0.000000e+00> : vector<4xf32>
    %22 = vector.multi_reduction <add>, %21, %cst_7 [1] : vector<4x10xf32> to vector<4xf32>
    %23 = vector.shape_cast %22 : vector<4xf32> to vector<4x1xf32>
    %24 = math.log %23 : vector<4x1xf32>
    %cst_8 = arith.constant dense<0xFF800000> : vector<4xf32>
    %25 = vector.multi_reduction <maximumf>, %16, %cst_8 [1] : vector<4x10xf32> to vector<4xf32>
    %26 = vector.shape_cast %25 : vector<4xf32> to vector<4x1xf32>
    %27 = vector.broadcast %26 : vector<4x1xf32> to vector<4x10xf32>
    %28 = arith.subf %16, %27 : vector<4x10xf32>
    %29 = math.exp %28 : vector<4x10xf32>
    %cst_9 = arith.constant dense<0.000000e+00> : vector<4xf32>
    %30 = vector.multi_reduction <add>, %29, %cst_9 [1] : vector<4x10xf32> to vector<4xf32>
    %31 = vector.shape_cast %30 : vector<4xf32> to vector<4x1xf32>
    %32 = math.log %31 : vector<4x1xf32>
    %33 = arith.subf %28, %20 : vector<4x10xf32>
    %34 = arith.mulf %29, %33 : vector<4x10xf32>
    %cst_10 = arith.constant dense<0.000000e+00> : vector<4xf32>
    %35 = vector.multi_reduction <add>, %34, %cst_10 [1] : vector<4x10xf32> to vector<4xf32>
    %36 = vector.shape_cast %35 : vector<4xf32> to vector<4x1xf32>
    %37 = arith.divf %36, %31 : vector<4x1xf32>
    %38 = arith.subf %24, %32 : vector<4x1xf32>
    %39 = arith.addf %37, %38 : vector<4x1xf32>
    %c0_11 = arith.constant 0 : index
    %c0_12 = arith.constant 0 : index
    %40 = vector.load %arg5[%c0_11, %c0_12] : memref<4x1xf32, #tpu.memory_space<vmem>>, vector<4x1xf32>
    %cst_13 = arith.constant 0.000000e+00 : f32
    %41 = vector.broadcast %cst_13 : f32 to vector<4x1xf32>
    %42 = arith.select %10, %39, %41 : vector<4x1xi1>, vector<4x1xf32>
    %43 = arith.addf %40, %42 : vector<4x1xf32>
    %c0_14 = arith.constant 0 : index
    %c0_15 = arith.constant 0 : index
    %44 = vector.load %arg5[%c0_14, %c0_15] : memref<4x1xf32, #tpu.memory_space<vmem>>, vector<4x1xf32>
    tpu.vector_store %arg5[%c0_14, %c0_15], %43 {strides = array<i32>} : memref<4x1xf32, #tpu.memory_space<vmem>>, vector<4x1xf32>,
    %c0_i32_16 = arith.constant 0 : i32
    %45 = arith.cmpi eq, %arg1, %c0_i32_16 : i32
    %46 = arith.extui %45 : i1 to i32
    %c0_i32_17 = arith.constant 0 : i32
    %47 = arith.cmpi ne, %46, %c0_i32_17 : i32
    scf.if %47 {
      %c0_18 = arith.constant 0 : index
      %c0_19 = arith.constant 0 : index
      %48 = vector.load %arg5[%c0_18, %c0_19] : memref<4x1xf32, #tpu.memory_space<vmem>>, vector<4x1xf32>
      %49 = vector.shape_cast %48 : vector<4x1xf32> to vector<1x4x1xf32>
      %cst_20 = arith.constant dense<0.000000e+00> : vector<1xf32>
      %50 = vector.multi_reduction <add>, %49, %cst_20 [1, 2] : vector<1x4x1xf32> to vector<1xf32>
      %51 = vector.shape_cast %50 : vector<1xf32> to vector<1x1x1xf32>
      %52 = vector.extract %51[0, 0, 0] : f32 from vector<1x1x1xf32>
      %53 = vector.broadcast %52 : f32 to vector<1x1xf32>
      %54 = vector.shape_cast %53 : vector<1x1xf32> to vector<1x1xf32>
      %55 = vector.broadcast %54 : vector<1x1xf32> to vector<8x128xf32>
      %c0_21 = arith.constant 0 : index
      %c0_22 = arith.constant 0 : index
      %56 = vector.load %arg4[%c0_21, %c0_22] : memref<8x128xf32, #tpu.memory_space<vmem>>, vector<8x128xf32>
      tpu.vector_store %arg4[%c0_21, %c0_22], %55 {strides = array<i32>} : memref<8x128xf32, #tpu.memory_space<vmem>>, vector<8x128xf32>,
    } else {
    }
    return
  }
  func.func @transform_0(%arg0: i32, %arg1: i32) -> (i32, i32) {
    %c1_i32 = arith.constant 1 : i32
    %0 = arith.muli %arg0, %c1_i32 : i32
    %1 = arith.addi %0, %arg1 : i32
    %c0_i32 = arith.constant 0 : i32
    %2 = arith.minsi %1, %c0_i32 : i32
    %c0_i32_0 = arith.constant 0 : i32
    %c0_i32_1 = arith.constant 0 : i32
    return %2, %c0_i32_0 : i32, i32
  }
  func.func @transform_1(%arg0: i32, %arg1: i32) -> (i32, i32) {
    %c1_i32 = arith.constant 1 : i32
    %0 = arith.muli %arg0, %c1_i32 : i32
    %1 = arith.addi %0, %arg1 : i32
    %c0_i32 = arith.constant 0 : i32
    %2 = arith.minsi %1, %c0_i32 : i32
    %c0_i32_0 = arith.constant 0 : i32
    %c0_i32_1 = arith.constant 0 : i32
    return %2, %c0_i32_0 : i32, i32
  }
  func.func @transform_2(%arg0: i32, %arg1: i32) -> (i32, i32) {
    %c0_i32 = arith.constant 0 : i32
    %c0_i32_0 = arith.constant 0 : i32
    return %arg0, %c0_i32 : i32, i32
  }
}

</mosaic_0001>

<bundles_post_ra>
// kernel: tpu_custom_call.1
= control target key start
LH: loop header
LB: loop body
LE: loop exit
PB: predicated region body
PF: predicated region fallthrough
CT: control target
= control target key end

     0   :  { %7 = vsyncpa [#allocation4], 0  ;;  %s260_s0 = inlined_call_operand.hbm [shape: f32[4,10], index: 0, kind: input, shape index: {}]   ;;  %s261_s1 = inlined_call_operand.hbm [shape: f32[4,10], index: 1, kind: input, shape index: {}]   ;;  %s262_s2 = inlined_call_operand.hbm [shape: f32[8,128], index: 2, kind: output, shape index: {}]  }
   0x1   :  { %8 = vsyncpa [#allocation7], 0 }
   0x2   :  { %9 = vsyncpa [#allocation5], 0  ;;  %s224_s9 = smov [#allocation3]   ;;  %s225_s11 = smov [#allocation6]  }
   0x3   :  { %s21_s10 = sshll.u32 %s224_s9, 4  ;;  %s36_s12 = sshll.u32 %s225_s11, 4  ;;  %s22_s10 = int_to_ptr.vmem [resolvable:$true] %s21_s10  ;;  %s37_s12 = int_to_ptr.vmem [resolvable:$true] %s36_s12 }
   0x4   :  { %s166_s13 = scalar_lea.vmem %s22_s10, 64  ;;  %p171_p1 = scmp.lt.s32.totalorder %s22_s10, %s22_s10 }
   0x5   :  { %p167_p0 = scmp.ne.s32.totalorder %s22_s10, %s166_s13  ;;  %p172_p2 = scmp.lt.s32.totalorder %s166_s13, %s166_s13 }
   0x7   :  { %p173_p3 = por %p172_p2, %p171_p1 }
   0x9   :  { %p174_p4 = pnand %p173_p3, %p167_p0 }
   0xb   :  { %177 = shalt.err (!%p174_p4)
}
   0xc   :  { %24 = dma.hbm_to_vmem [thread:$0]  %s260_s0, 64, %s22_s10, [#allocation4]  }
   0xd   :  { %s186_s16 = scalar_lea.vmem %s37_s12, 64  ;;  %p191_p6 = scmp.lt.s32.totalorder %s37_s12, %s37_s12 }
   0xe   :  { %p187_p5 = scmp.ne.s32.totalorder %s37_s12, %s186_s16  ;;  %p192_p7 = scmp.lt.s32.totalorder %s186_s16, %s186_s16 }
  0x10   :  { %p193_p8 = por %p192_p7, %p191_p6 }
  0x12   :  { %p194_p9 = pnand %p193_p8, %p187_p5 }
  0x14   :  { %197 = shalt.err (!%p194_p9)
}
  0x15   :  { %39 = dma.hbm_to_vmem [thread:$0]  %s261_s1, 64, %s37_s12, [#allocation7]  }
  0x16   :  { %218 = dma.done.wait [#allocation4], 64  }
  0x17   :  { %219 = vsyncadd [#allocation4], 4294967232 }
  0x18   :  { %220 = dma.done.wait [#allocation7], 64  }
  0x19   :  { %221 = vsyncadd [#allocation7], 4294967232  ;;  %v65_v0 = vld [vmem:[#allocation3] sm:$0xf]  ;;  %vm69_vm0 = vcmask 76800   ;;  %vm56_vm1 = vcmask 3072   ;;  %v60_v22 = vlaneseq }
  0x1a   :  { %v67_v1 = vld [vmem:[#allocation6] sm:$0xf]  ;;  %v66_v2 = vmul.f32 0.25, %v65_v0  ;;  %v226_v19 = vmov 0.0   ;;  %s227_s0 = smov [#allocation8]  }
  0x1b   :  { %v68_v3 = vmul.f32 0.25, %v67_v1  ;;  %57 = vst.msk [vmem:[#allocation2] sm:$0xf] %vm56_vm1, %v226_v19  ;;  %v61_v25 = vshrl.u32 %v60_v22, 7  ;;  %s128_s1 = sshll.u32 %s227_s0, 4  ;;  %s129_s1 = int_to_ptr.vmem [resolvable:$true] %s128_s1 }
  0x1c   :  { %v70_v4 = vsel %vm69_vm0, %v66_v2, -inf  ;;  %s198_s20 = scalar_lea.vmem %s129_s1, 128  ;;  %p203_p11 = scmp.lt.s32.totalorder %s129_s1, %s129_s1 }
  0x1d   :  { %71 = vmax.xlane.f32.xlu0 %v70_v4  ;;  %v81_v5 = vsel %vm69_vm0, %v68_v3, -inf  ;;  %vm64_vm2 = vcmp.lt.s32.totalorder %v61_v25, 4  ;;  %p199_p10 = scmp.ne.s32.totalorder %s129_s1, %s198_s20  ;;  %p204_p12 = scmp.lt.s32.totalorder %s198_s20, %s198_s20 }
  0x1f   :  { %p205_p13 = por %p204_p12, %p203_p11 }
  0x21   :  { %82 = vmax.xlane.f32.xlu0 %v81_v5  ;;  %p206_p0 = pnand %p205_p13, %p199_p10 }
  0x22   :  { %v101_v33 = vld [vmem:[#allocation2] sm:$0xf] }
  0xa6   :  { %v72_v6 = vpop.xlane.xlu0 %71 }
  0xa7   :  { %v73_v7 = vsub.f32 %v66_v2, %v72_v6 }
  0xa9   :  { %v74_v8 = vmul.f32 1.442695, %v73_v7 }
  0xaa   :  { %v83_v9 = vpop.xlane.xlu0 %82 }
  0xab   :  { %148 = vpow2.f32 %v74_v8  ;;  %v84_v10 = vsub.f32 %v68_v3, %v83_v9 }
  0xad   :  { %v85_v11 = vmul.f32 1.442695, %v84_v10  ;;  %v92_v14 = vsub.f32 %v84_v10, %v73_v7 }
  0xaf   :  { %150 = vpow2.f32 %v85_v11 }
  0xb8   :  { %v149_v12 = vpop.eup %148 }
  0xb9   :  { %v76_v13 = vsel %vm69_vm0, %v149_v12, 0.0 }
  0xba   :  { %77 = vadd.xlane.f32.xlu1 %v76_v13 }
  0xbc   :  { %v151_v15 = vpop.eup %150 }
  0xbd   :  { %v87_v16 = vsel %vm69_vm0, %v151_v15, 0.0  ;;  %v93_v17 = vmul.f32 %v151_v15, %v92_v14 }
  0xbe   :  { %88 = vadd.xlane.f32.xlu1 %v87_v16 }
  0xbf   :  { %v94_v18 = vsel %vm69_vm0, %v93_v17, 0.0 }
  0xc0   :  { %95 = vadd.xlane.f32.xlu0 %v94_v18 }
 0x143   :  { %v78_v20 = vpop.xlane.xlu1 %77 }
 0x144   :  { %152 = vlog2.f32 %v78_v20 }
 0x147   :  { %v89_v21 = vpop.xlane.xlu1 %88 }
 0x148   :  { %154 = vlog2.f32 %v89_v21 }
 0x149   :  { %156 = vrcp.f32 %v89_v21  ;;  %v96_v29 = vpop.xlane.xlu0 %95 }
 0x151   :  { %v153_v23 = vpop.eup %152 }
 0x152   :  { %v80_v27 = vmul.f32 0.6931472, %v153_v23 }
 0x155   :  { %v155_v24 = vpop.eup %154 }
 0x156   :  { %v157_v26 = vpop.eup %156  ;;  %v91_v28 = vmul.f32 0.6931472, %v155_v24 }
 0x157   :  { %v98_v30 = vmul.f32 %v157_v26, %v96_v29 }
 0x158   :  { %v99_v31 = vsub.f32 %v80_v27, %v91_v28 }
 0x15a   :  { %v100_v32 = vadd.f32 %v99_v31, %v98_v30 }
 0x15c   :  { %v102_v34 = vsel %vm64_vm2, %v100_v32, 0.0 }
 0x15d   :  { %v103_v35 = vadd.f32 %v102_v34, %v101_v33 }
 0x15f   :  { %105 = vst.msk [vmem:[#allocation2] sm:$0xf] %vm56_vm1, %v103_v35 }
 0x166   :  { %v109_v36 = vld [vmem:[#allocation2] sm:$0xf] }
 0x167   :  { %v110_v37 = vsel %vm56_vm1, %v109_v36, 0.0 }
 0x168   :  { %111 = vadd.xlane.f32.xlu1 %v110_v37 }
 0x1f1   :  { %v112_v38 = vpop.xlane.xlu1 %111 }
 0x1f2   :  { %v113_v39 = vrot.slane %v112_v38, 4 }
 0x1f4   :  { %v114_v40 = vadd.f32 %v113_v39, %v112_v38 }
 0x1f6   :  { %v115_v41 = vrot.slane %v114_v40, 2 }
 0x1f8   :  { %v116_v42 = vadd.f32 %v115_v41, %v114_v40 }
 0x1fa   :  { %v117_v43 = vrot.slane %v116_v42, 1 }
 0x1fc   :  { %v118_v44 = vadd.f32 %v117_v43, %v116_v42 }
 0x1fe   :  { %142 = vpush %v118_v44 }
 0x22f   :  { %s143_s19 = spop %142 }
 0x230   :  { %v120_v45 = vstv %s143_s19 }
 0x231   :  { %121 = vst [vmem:[#allocation8] sm:$0xff] %v120_v45 }
 0x232   :  { %209 = shalt.err (!%p206_p0)
}
 0x233   :  { %131 = dma.vmem_to_hbm [thread:$0]  %s129_s1, 128, %s262_s2, [#allocation5]  }
 0x234   :  { %222 = dma.done.wait [#allocation5], 128  }
 0x235   :  { %223 = vsyncadd [#allocation5], 4294967168 }
 0x236   :  { %135 = vsyncpa [#allocation4], 1 }
 0x237   :  { %136 = vsyncpa [#allocation7], 1 }
 0x238   :  { %137 = vsyncpa [#allocation5], 1 }

</bundles_post_ra>
